<compile_context>
chip_gen: v6e
topology: v6e:2x2x1
jax: 0.10.0
libtpu: 0.0.40
codegen_flags: <defaults>
</compile_context>

<pallas_src>
import functools

import jax
import jax.numpy as jnp
from jax import lax
from jax.experimental import pallas as pl
from jax.experimental.pallas import tpu as pltpu


def _scl_kernel(*refs, inv_temp, use_labels):
    if use_labels:
        xr_ref, xc_ref, lr_ref, lc_ref = refs[:4]
        rest = refs[4:]
    else:
        xr_ref, xc_ref, m_ref = refs[:3]
        rest = refs[3:]
    per_row_ref, valid_ref, denom_acc, possum_acc, npos_acc = rest

    k = pl.program_id(1)
    nk = pl.num_programs(1)
    tq = xr_ref.shape[0]
    tk = xc_ref.shape[0]

    @pl.when(k == 0)
    def _init():
        denom_acc[...] = jnp.zeros_like(denom_acc)
        possum_acc[...] = jnp.zeros_like(possum_acc)
        npos_acc[...] = jnp.zeros_like(npos_acc)

    # F.normalize(p=2, dim=1): x / max(||x||_2, 1e-12); all math kept in f32.
    xr = xr_ref[...].astype(jnp.float32)                              # [tq, D]
    xc = xc_ref[...].astype(jnp.float32)                              # [tk, D]
    xr = xr / jnp.maximum(jnp.sqrt(jnp.sum(xr * xr, axis=1, keepdims=True)), 1e-12)
    xc = xc / jnp.maximum(jnp.sqrt(jnp.sum(xc * xc, axis=1, keepdims=True)), 1e-12)

    # Similarity tile on the MXU: [tq, D] x [tk, D]^T -> [tq, tk].
    sim = lax.dot_general(xr, xc, (((1,), (1,)), ((), ())),
                          preferred_element_type=jnp.float32)
    # Constant shift: cosine similarity <= 1 so inv_temp upper-bounds the logits,
    # and the loss is shift-invariant -> no per-row max reduction needed.
    logits = sim * inv_temp - inv_temp
    e = jnp.exp(logits)

    # Global row / column indices of this tile -> off-diagonal predicate.
    gr = pl.program_id(0) * tq + lax.broadcasted_iota(jnp.int32, (tq, tk), 0)
    gc = k * tk + lax.broadcasted_iota(jnp.int32, (tq, tk), 1)
    off_diag = gr != gc

    if use_labels:
        # positives = same label, off-diagonal;  pos + neg == 1 - eye.
        pos = jnp.logical_and(lr_ref[...] == lc_ref[...], off_diag)
        pos_f = pos.astype(jnp.float32)
        denom_part = jnp.where(off_diag, e, 0.0)
        possum_part = jnp.where(pos, logits, 0.0)
    else:
        m = m_ref[...].astype(jnp.float32)
        pos_f = m * off_diag.astype(jnp.float32)            # mask * (1 - eye)
        w = jnp.where(off_diag, 1.0, 1.0 - m)               # pos + neg == 1 - mask*eye
        denom_part = e * w
        possum_part = pos_f * logits

    denom_acc[...] += jnp.sum(denom_part, axis=1, keepdims=True)
    possum_acc[...] += jnp.sum(possum_part, axis=1, keepdims=True)
    npos_acc[...] += jnp.sum(pos_f, axis=1, keepdims=True)

    @pl.when(k == nk - 1)
    def _epilogue():
        npos = npos_acc[...]
        valid = npos > 0.0
        # sum_j pos*log_prob = sum_j pos*logits - num_pos * log(denominator)
        row_sum = possum_acc[...] - npos * jnp.log(denom_acc[...])
        per_row_ref[...] = jnp.where(valid, row_sum / jnp.where(valid, npos, 1.0), 0.0)
        valid_ref[...] = valid.astype(jnp.float32)


def _pick_tile(b, target, granule):
    """Largest divisor of b that is <= target and a multiple of `granule`,
    falling back to b itself (full-extent block) if none exists."""
    if b <= target:
        return b
    t = (target // granule) * granule
    while t >= granule:
        if b % t == 0:
            return t
        t -= granule
    return b


def gesture_contrastive_loss(gesture_embedding, labels=None, mask=None,
                             temperature=0.5, *, tq=None, tk=None):
    if labels is not None and mask is not None:
        raise ValueError("Cannot define both `labels` and `mask`")
    gesture_embedding = jnp.asarray(gesture_embedding)
    B, D = gesture_embedding.shape

    # Tile sizes: tq on the sublane granule (8), tk on the lane granule (128),
    # or full extent when B is small / indivisible.
    if tq is None:
        tq = _pick_tile(B, 256, 8)
    if tk is None:
        tk = _pick_tile(B, 512, 128)
    assert B % tq == 0 and B % tk == 0, (B, tq, tk)

    use_labels = mask is None
    if use_labels:
        if labels is None:
            # identity mask == every sample is its own class
            labels = jnp.arange(B, dtype=jnp.int32)
        else:
            labels = jnp.asarray(labels).reshape(-1).astype(jnp.int32)
            if labels.shape[0] != B:
                raise ValueError("Num of labels does not match num of features")
        inputs = (gesture_embedding, gesture_embedding,
                  labels.reshape(B, 1), labels.reshape(1, B))
        in_specs = [
            pl.BlockSpec((tq, D), lambda i, k: (i, 0)),   # row-block embeddings
            pl.BlockSpec((tk, D), lambda i, k: (k, 0)),   # col-block embeddings
            pl.BlockSpec((tq, 1), lambda i, k: (i, 0)),   # row labels
            pl.BlockSpec((1, tk), lambda i, k: (0, k)),   # col labels
        ]
    else:
        mask = jnp.asarray(mask)
        if mask.shape != (B, B):
            raise ValueError("mask must be [batch, batch]")
        inputs = (gesture_embedding, gesture_embedding, mask)
        in_specs = [
            pl.BlockSpec((tq, D), lambda i, k: (i, 0)),
            pl.BlockSpec((tk, D), lambda i, k: (k, 0)),
            pl.BlockSpec((tq, tk), lambda i, k: (i, k)),
        ]

    kernel = functools.partial(_scl_kernel, inv_temp=1.0 / float(temperature),
                               use_labels=use_labels)
    per_row, valid = pl.pallas_call(
        kernel,
        out_shape=(jax.ShapeDtypeStruct((B, 1), jnp.float32),
                   jax.ShapeDtypeStruct((B, 1), jnp.float32)),
        grid_spec=pltpu.PrefetchScalarGridSpec(
            num_scalar_prefetch=0,
            grid=(B // tq, B // tk),
            in_specs=in_specs,
            out_specs=[pl.BlockSpec((tq, 1), lambda i, k: (i, 0)),
                       pl.BlockSpec((tq, 1), lambda i, k: (i, 0))],
            scratch_shapes=[pltpu.VMEM((tq, 1), jnp.float32)] * 3,
        ),
        compiler_params=pltpu.CompilerParams(
            dimension_semantics=("parallel", "arbitrary")),
    )(*inputs)

    # torch boolean indexing `[num_positives_per_row > 0]` has dynamic shape;
    # equivalent masked mean over valid rows (NaN if empty, same as torch
    # mean of an empty tensor).
    n_valid = jnp.sum(valid)
    mean_log_prob = jnp.sum(per_row) / n_valid
    return -mean_log_prob * float(temperature)
    # TODO(synk): the torch isnan -> raise ValueError paths have no in-kernel
    # exception equivalent and are omitted.


def _reference_loss(gesture_embedding, labels=None, mask=None, temperature=0.5):
    x = gesture_embedding.astype(jnp.float32)
    x = x / jnp.maximum(jnp.sqrt(jnp.sum(x * x, axis=1, keepdims=True)), 1e-12)
    B = x.shape[0]
    if mask is None:
        if labels is None:
            mask = jnp.eye(B, dtype=jnp.float32)
        else:
            mask = (labels.reshape(-1, 1) == labels.reshape(1, -1)).astype(jnp.float32)
    else:
        mask = mask.astype(jnp.float32)
    adc = (x @ x.T) / temperature
    logits = adc - jnp.max(adc, axis=1, keepdims=True)
    exp_logits = jnp.exp(logits)
    logits_mask = 1.0 - jnp.eye(B, dtype=jnp.float32)
    pos = mask * logits_mask
    neg = 1.0 - mask
    num_pos = jnp.sum(pos, axis=1)
    denom = (jnp.sum(exp_logits * neg, axis=1, keepdims=True)
             + jnp.sum(exp_logits * pos, axis=1, keepdims=True))
    log_probs = logits - jnp.log(denom)
    row_sum = jnp.sum(log_probs * pos, axis=1)
    valid = num_pos > 0
    per_row = jnp.where(valid, row_sum / jnp.where(valid, num_pos, 1.0), 0.0)
    mean_lp = jnp.sum(per_row) / jnp.sum(valid.astype(jnp.float32))
    return -mean_lp * temperature


if __name__ == "__main__":
    # Small test (single-tile grid), labels path.
    key = jax.random.PRNGKey(0)
    B, D = 8, 32
    emb = jax.random.normal(key, (B, D), dtype=jnp.float32)
    labels = jnp.array([0, 1, 2, 3, 0, 1, 2, 3], dtype=jnp.int32)

    loss = jax.block_until_ready(
        gesture_contrastive_loss(emb, labels=labels, temperature=0.5))
    ref = _reference_loss(emb, labels=labels, temperature=0.5)
    assert jnp.isfinite(loss), "kernel loss is not finite"
    assert jnp.allclose(loss, ref, rtol=1e-5, atol=1e-5), (loss, ref)

    # Explicit dense-mask path (same mask the labels would produce).
    dense_mask = (labels.reshape(-1, 1) == labels.reshape(1, -1)).astype(jnp.float32)
    loss_m = jax.block_until_ready(
        gesture_contrastive_loss(emb, mask=dense_mask, temperature=0.5))
    assert jnp.allclose(loss_m, ref, rtol=1e-5, atol=1e-5), (loss_m, ref)

    # Tiled path (grid 4x2) exercising per-row accumulation across column blocks.
    key2, key3 = jax.random.split(jax.random.PRNGKey(1))
    B2, D2 = 256, 64
    emb2 = jax.random.normal(key2, (B2, D2), dtype=jnp.float32)
    labels2 = jax.random.randint(key3, (B2,), 0, 8, dtype=jnp.int32)
    loss2 = jax.block_until_ready(
        gesture_contrastive_loss(emb2, labels=labels2, temperature=0.5, tq=64, tk=128))
    ref2 = _reference_loss(emb2, labels=labels2, temperature=0.5)
    assert jnp.isfinite(loss2), "tiled kernel loss is not finite"
    assert jnp.allclose(loss2, ref2, rtol=1e-4, atol=1e-5), (loss2, ref2)

    print("KERNEL_OK")
</pallas_src>

<mosaic_0001>
module attributes {stable_mosaic.version = 11 : i64} {
  func.func @_scl_kernel(%arg0: i32, %arg1: i32, %arg2: memref<8x32xf32, #tpu.memory_space<vmem>>, %arg3: memref<8x32xf32, #tpu.memory_space<vmem>>, %arg4: memref<8x1xi32, #tpu.memory_space<vmem>>, %arg5: memref<1x8xi32, #tpu.memory_space<vmem>>, %arg6: memref<8x1xf32, #tpu.memory_space<vmem>>, %arg7: memref<8x1xf32, #tpu.memory_space<vmem>>, %arg8: memref<8x1xf32, #tpu.memory_space<vmem>>, %arg9: memref<8x1xf32, #tpu.memory_space<vmem>>, %arg10: memref<8x1xf32, #tpu.memory_space<vmem>>) attributes {dimension_semantics = [#tpu.dimension_semantics<parallel>, #tpu.dimension_semantics<arbitrary>], iteration_bounds = array<i64: 1, 1>, scalar_prefetch = 0 : i64, scratch_operands = 3 : i64, tpu.core_type = #tpu.core_type<tc>, window_params = [{transform_indices = @transform_0, window_bounds = array<i64: 8, 32>}, {transform_indices = @transform_1, window_bounds = array<i64: 8, 32>}, {transform_indices = @transform_2, window_bounds = array<i64: 8, 1>}, {transform_indices = @transform_3, window_bounds = array<i64: 1, 8>}, {transform_indices = @transform_4, window_bounds = array<i64: 8, 1>}, {transform_indices = @transform_5, window_bounds = array<i64: 8, 1>}]} {
    %c0_i32 = arith.constant 0 : i32
    %0 = arith.cmpi eq, %arg1, %c0_i32 : i32
    %1 = arith.extui %0 : i1 to i32
    %c0_i32_0 = arith.constant 0 : i32
    %2 = arith.cmpi ne, %1, %c0_i32_0 : i32
    scf.if %2 {
      %cst_34 = arith.constant 0.000000e+00 : f32
      %66 = vector.broadcast %cst_34 : f32 to vector<8x1xf32>
      %c0_35 = arith.constant 0 : index
      %c0_36 = arith.constant 0 : index
      %67 = vector.load %arg8[%c0_35, %c0_36] : memref<8x1xf32, #tpu.memory_space<vmem>>, vector<8x1xf32>
      tpu.vector_store %arg8[%c0_35, %c0_36], %66 {strides = array<i32>} : memref<8x1xf32, #tpu.memory_space<vmem>>, vector<8x1xf32>,
      %cst_37 = arith.constant 0.000000e+00 : f32
      %68 = vector.broadcast %cst_37 : f32 to vector<8x1xf32>
      %c0_38 = arith.constant 0 : index
      %c0_39 = arith.constant 0 : index
      %69 = vector.load %arg9[%c0_38, %c0_39] : memref<8x1xf32, #tpu.memory_space<vmem>>, vector<8x1xf32>
      tpu.vector_store %arg9[%c0_38, %c0_39], %68 {strides = array<i32>} : memref<8x1xf32, #tpu.memory_space<vmem>>, vector<8x1xf32>,
      %cst_40 = arith.constant 0.000000e+00 : f32
      %70 = vector.broadcast %cst_40 : f32 to vector<8x1xf32>
      %c0_41 = arith.constant 0 : index
      %c0_42 = arith.constant 0 : index
      %71 = vector.load %arg10[%c0_41, %c0_42] : memref<8x1xf32, #tpu.memory_space<vmem>>, vector<8x1xf32>
      tpu.vector_store %arg10[%c0_41, %c0_42], %70 {strides = array<i32>} : memref<8x1xf32, #tpu.memory_space<vmem>>, vector<8x1xf32>,
    } else {
    }
    %c0 = arith.constant 0 : index
    %c0_1 = arith.constant 0 : index
    %3 = vector.load %arg2[%c0, %c0_1] : memref<8x32xf32, #tpu.memory_space<vmem>>, vector<8x32xf32>
    %c0_2 = arith.constant 0 : index
    %c0_3 = arith.constant 0 : index
    %4 = vector.load %arg3[%c0_2, %c0_3] : memref<8x32xf32, #tpu.memory_space<vmem>>, vector<8x32xf32>
    %5 = arith.mulf %3, %3 : vector<8x32xf32>
    %cst = arith.constant dense<0.000000e+00> : vector<8xf32>
    %6 = vector.multi_reduction <add>, %5, %cst [1] : vector<8x32xf32> to vector<8xf32>
    %7 = vector.shape_cast %6 : vector<8xf32> to vector<8x1xf32>
    %8 = math.sqrt %7 : vector<8x1xf32>
    %cst_4 = arith.constant 9.99999996E-13 : f32
    %9 = vector.broadcast %cst_4 : f32 to vector<8x1xf32>
    %10 = arith.maximumf %8, %9 : vector<8x1xf32>
    %11 = vector.broadcast %10 : vector<8x1xf32> to vector<8x32xf32>
    %12 = arith.divf %3, %11 : vector<8x32xf32>
    %13 = arith.mulf %4, %4 : vector<8x32xf32>
    %cst_5 = arith.constant dense<0.000000e+00> : vector<8xf32>
    %14 = vector.multi_reduction <add>, %13, %cst_5 [1] : vector<8x32xf32> to vector<8xf32>
    %15 = vector.shape_cast %14 : vector<8xf32> to vector<8x1xf32>
    %16 = math.sqrt %15 : vector<8x1xf32>
    %cst_6 = arith.constant 9.99999996E-13 : f32
    %17 = vector.broadcast %cst_6 : f32 to vector<8x1xf32>
    %18 = arith.maximumf %16, %17 : vector<8x1xf32>
    %19 = vector.broadcast %18 : vector<8x1xf32> to vector<8x32xf32>
    %20 = arith.divf %4, %19 : vector<8x32xf32>
    %cst_7 = arith.constant dense<0.000000e+00> : vector<8x8xf32>
    %21 = tpu.matmul %12, %20, %cst_7 {dimension_numbers = #tpu.dot_dimension_numbers<[1], [1], [0], [0], [0, 0, 1, 0], [], []>} : vector<8x32xf32>, vector<8x32xf32>, vector<8x8xf32> -> vector<8x8xf32>
    %cst_8 = arith.constant 2.000000e+00 : f32
    %22 = vector.broadcast %cst_8 : f32 to vector<8x8xf32>
    %23 = arith.mulf %21, %22 : vector<8x8xf32>
    %cst_9 = arith.constant 2.000000e+00 : f32
    %24 = vector.broadcast %cst_9 : f32 to vector<8x8xf32>
    %25 = arith.subf %23, %24 : vector<8x8xf32>
    %26 = math.exp %25 : vector<8x8xf32>
    %c8_i32 = arith.constant 8 : i32
    %27 = arith.muli %arg0, %c8_i32 : i32
    %28 = tpu.iota {dimensions = array<i32: 0>} : vector<8x8xi32>
    %29 = vector.broadcast %27 : i32 to vector<8x8xi32>
    %30 = arith.addi %29, %28 : vector<8x8xi32>
    %c8_i32_10 = arith.constant 8 : i32
    %31 = arith.muli %arg1, %c8_i32_10 : i32
    %32 = tpu.iota {dimensions = array<i32: 1>} : vector<8x8xi32>
    %33 = vector.broadcast %31 : i32 to vector<8x8xi32>
    %34 = arith.addi %33, %32 : vector<8x8xi32>
    %35 = arith.cmpi ne, %30, %34 : vector<8x8xi32>
    %c0_11 = arith.constant 0 : index
    %c0_12 = arith.constant 0 : index
    %36 = vector.load %arg4[%c0_11, %c0_12] : memref<8x1xi32, #tpu.memory_space<vmem>>, vector<8x1xi32>
    %c0_13 = arith.constant 0 : index
    %c0_14 = arith.constant 0 : index
    %37 = vector.load %arg5[%c0_13, %c0_14] : memref<1x8xi32, #tpu.memory_space<vmem>>, vector<1x8xi32>
    %38 = vector.broadcast %36 : vector<8x1xi32> to vector<8x8xi32>
    %39 = vector.broadcast %37 : vector<1x8xi32> to vector<8x8xi32>
    %40 = arith.cmpi eq, %38, %39 : vector<8x8xi32>
    %41 = arith.andi %40, %35 : vector<8x8xi1>
    %42 = arith.extui %41 : vector<8x8xi1> to vector<8x8xi32>
    %43 = arith.sitofp %42 : vector<8x8xi32> to vector<8x8xf32>
    %cst_15 = arith.constant 0.000000e+00 : f32
    %44 = vector.broadcast %cst_15 : f32 to vector<8x8xf32>
    %45 = arith.select %35, %26, %44 : vector<8x8xi1>, vector<8x8xf32>
    %cst_16 = arith.constant 0.000000e+00 : f32
    %46 = vector.broadcast %cst_16 : f32 to vector<8x8xf32>
    %47 = arith.select %41, %25, %46 : vector<8x8xi1>, vector<8x8xf32>
    %c0_17 = arith.constant 0 : index
    %c0_18 = arith.constant 0 : index
    %48 = vector.load %arg8[%c0_17, %c0_18] : memref<8x1xf32, #tpu.memory_space<vmem>>, vector<8x1xf32>
    %cst_19 = arith.constant dense<0.000000e+00> : vector<8xf32>
    %49 = vector.multi_reduction <add>, %45, %cst_19 [1] : vector<8x8xf32> to vector<8xf32>
    %50 = vector.shape_cast %49 : vector<8xf32> to vector<8x1xf32>
    %51 = arith.addf %48, %50 : vector<8x1xf32>
    %c0_20 = arith.constant 0 : index
    %c0_21 = arith.constant 0 : index
    %52 = vector.load %arg8[%c0_20, %c0_21] : memref<8x1xf32, #tpu.memory_space<vmem>>, vector<8x1xf32>
    tpu.vector_store %arg8[%c0_20, %c0_21], %51 {strides = array<i32>} : memref<8x1xf32, #tpu.memory_space<vmem>>, vector<8x1xf32>,
    %c0_22 = arith.constant 0 : index
    %c0_23 = arith.constant 0 : index
    %53 = vector.load %arg9[%c0_22, %c0_23] : memref<8x1xf32, #tpu.memory_space<vmem>>, vector<8x1xf32>
    %cst_24 = arith.constant dense<0.000000e+00> : vector<8xf32>
    %54 = vector.multi_reduction <add>, %47, %cst_24 [1] : vector<8x8xf32> to vector<8xf32>
    %55 = vector.shape_cast %54 : vector<8xf32> to vector<8x1xf32>
    %56 = arith.addf %53, %55 : vector<8x1xf32>
    %c0_25 = arith.constant 0 : index
    %c0_26 = arith.constant 0 : index
    %57 = vector.load %arg9[%c0_25, %c0_26] : memref<8x1xf32, #tpu.memory_space<vmem>>, vector<8x1xf32>
    tpu.vector_store %arg9[%c0_25, %c0_26], %56 {strides = array<i32>} : memref<8x1xf32, #tpu.memory_space<vmem>>, vector<8x1xf32>,
    %c0_27 = arith.constant 0 : index
    %c0_28 = arith.constant 0 : index
    %58 = vector.load %arg10[%c0_27, %c0_28] : memref<8x1xf32, #tpu.memory_space<vmem>>, vector<8x1xf32>
    %cst_29 = arith.constant dense<0.000000e+00> : vector<8xf32>
    %59 = vector.multi_reduction <add>, %43, %cst_29 [1] : vector<8x8xf32> to vector<8xf32>
    %60 = vector.shape_cast %59 : vector<8xf32> to vector<8x1xf32>
    %61 = arith.addf %58, %60 : vector<8x1xf32>
    %c0_30 = arith.constant 0 : index
    %c0_31 = arith.constant 0 : index
    %62 = vector.load %arg10[%c0_30, %c0_31] : memref<8x1xf32, #tpu.memory_space<vmem>>, vector<8x1xf32>
    tpu.vector_store %arg10[%c0_30, %c0_31], %61 {strides = array<i32>} : memref<8x1xf32, #tpu.memory_space<vmem>>, vector<8x1xf32>,
    %c0_i32_32 = arith.constant 0 : i32
    %63 = arith.cmpi eq, %arg1, %c0_i32_32 : i32
    %64 = arith.extui %63 : i1 to i32
    %c0_i32_33 = arith.constant 0 : i32
    %65 = arith.cmpi ne, %64, %c0_i32_33 : i32
    scf.if %65 {
      %c0_34 = arith.constant 0 : index
      %c0_35 = arith.constant 0 : index
      %66 = vector.load %arg10[%c0_34, %c0_35] : memref<8x1xf32, #tpu.memory_space<vmem>>, vector<8x1xf32>
      %cst_36 = arith.constant 0.000000e+00 : f32
      %67 = vector.broadcast %cst_36 : f32 to vector<8x1xf32>
      %68 = arith.cmpf ogt, %66, %67 : vector<8x1xf32>
      %c0_37 = arith.constant 0 : index
      %c0_38 = arith.constant 0 : index
      %69 = vector.load %arg9[%c0_37, %c0_38] : memref<8x1xf32, #tpu.memory_space<vmem>>, vector<8x1xf32>
      %c0_39 = arith.constant 0 : index
      %c0_40 = arith.constant 0 : index
      %70 = vector.load %arg8[%c0_39, %c0_40] : memref<8x1xf32, #tpu.memory_space<vmem>>, vector<8x1xf32>
      %71 = math.log %70 : vector<8x1xf32>
      %72 = arith.mulf %66, %71 : vector<8x1xf32>
      %73 = arith.subf %69, %72 : vector<8x1xf32>
      %cst_41 = arith.constant 1.000000e+00 : f32
      %74 = vector.broadcast %cst_41 : f32 to vector<8x1xf32>
      %75 = arith.select %68, %66, %74 : vector<8x1xi1>, vector<8x1xf32>
      %76 = arith.divf %73, %75 : vector<8x1xf32>
      %cst_42 = arith.constant 0.000000e+00 : f32
      %77 = vector.broadcast %cst_42 : f32 to vector<8x1xf32>
      %78 = arith.select %68, %76, %77 : vector<8x1xi1>, vector<8x1xf32>
      %c0_43 = arith.constant 0 : index
      %c0_44 = arith.constant 0 : index
      %79 = vector.load %arg6[%c0_43, %c0_44] : memref<8x1xf32, #tpu.memory_space<vmem>>, vector<8x1xf32>
      tpu.vector_store %arg6[%c0_43, %c0_44], %78 {strides = array<i32>} : memref<8x1xf32, #tpu.memory_space<vmem>>, vector<8x1xf32>,
      %80 = arith.extui %68 : vector<8x1xi1> to vector<8x1xi32>
      %81 = arith.sitofp %80 : vector<8x1xi32> to vector<8x1xf32>
      %c0_45 = arith.constant 0 : index
      %c0_46 = arith.constant 0 : index
      %82 = vector.load %arg7[%c0_45, %c0_46] : memref<8x1xf32, #tpu.memory_space<vmem>>, vector<8x1xf32>
      tpu.vector_store %arg7[%c0_45, %c0_46], %81 {strides = array<i32>} : memref<8x1xf32, #tpu.memory_space<vmem>>, vector<8x1xf32>,
    } else {
    }
    return
  }
  func.func @transform_0(%arg0: i32, %arg1: i32) -> (i32, i32) {
    %c0_i32 = arith.constant 0 : i32
    %c0_i32_0 = arith.constant 0 : i32
    return %arg0, %c0_i32 : i32, i32
  }
  func.func @transform_1(%arg0: i32, %arg1: i32) -> (i32, i32) {
    %c0_i32 = arith.constant 0 : i32
    %c0_i32_0 = arith.constant 0 : i32
    return %arg1, %c0_i32 : i32, i32
  }
  func.func @transform_2(%arg0: i32, %arg1: i32) -> (i32, i32) {
    %c0_i32 = arith.constant 0 : i32
    %c0_i32_0 = arith.constant 0 : i32
    return %arg0, %c0_i32 : i32, i32
  }
  func.func @transform_3(%arg0: i32, %arg1: i32) -> (i32, i32) {
    %c0_i32 = arith.constant 0 : i32
    %c0_i32_0 = arith.constant 0 : i32
    return %c0_i32, %arg1 : i32, i32
  }
  func.func @transform_4(%arg0: i32, %arg1: i32) -> (i32, i32) {
    %c0_i32 = arith.constant 0 : i32
    %c0_i32_0 = arith.constant 0 : i32
    return %arg0, %c0_i32 : i32, i32
  }
  func.func @transform_5(%arg0: i32, %arg1: i32) -> (i32, i32) {
    %c0_i32 = arith.constant 0 : i32
    %c0_i32_0 = arith.constant 0 : i32
    return %arg0, %c0_i32 : i32, i32
  }
}

</mosaic_0001>

<bundles_post_ra>
// kernel: tpu_custom_call.1
= control target key start
LH: loop header
LB: loop body
LE: loop exit
PB: predicated region body
PF: predicated region fallthrough
CT: control target
= control target key end

     0   :  { %11 = vsyncpa [#allocation6], 0  ;;  %s279_s18 = smov [#allocation5]   ;;  %s366_s0 = inlined_call_operand.vmem [shape: f32[8,32], index: 0, kind: input, shape index: {}]   ;;  %s367_s1 = inlined_call_operand.hbm [shape: f32[8,32], index: 1, kind: input, shape index: {}]   ;;  %s368_s2 = inlined_call_operand.vmem [shape: s32[8,1], index: 2, kind: input, shape index: {}]   ;;  %s369_s3 = inlined_call_operand.vmem [shape: s32[1,8], index: 3, kind: input, shape index: {}]   ;;  %s370_s4 = inlined_call_operand.vmem [shape: f32[8,1], index: 4, kind: output, shape index: {0}]   ;;  %s371_s5 = inlined_call_operand.vmem [shape: f32[8,1], index: 5, kind: output, shape index: {1}]  }
   0x1   :  { %s20_s19 = sshll.u32 %s279_s18, 4  ;;  %s21_s19 = int_to_ptr.vmem [resolvable:$true] %s20_s19 }
   0x2   :  { %s265_s20 = scalar_lea.vmem %s21_s19, 128  ;;  %p270_p1 = scmp.lt.s32.totalorder %s21_s19, %s21_s19 }
   0x3   :  { %p266_p0 = scmp.ne.s32.totalorder %s21_s19, %s265_s20  ;;  %p271_p2 = scmp.lt.s32.totalorder %s265_s20, %s265_s20 }
   0x5   :  { %p272_p3 = por %p271_p2, %p270_p1 }
   0x7   :  { %p273_p4 = pnand %p272_p3, %p266_p0 }
   0x9   :  { %276 = shalt.err (!%p273_p4)
}
   0xa   :  { %23 = dma.hbm_to_vmem [thread:$0]  %s367_s1, 128, %s21_s19, [#allocation6]  }
   0xb   :  { %277 = dma.done.wait [#allocation6], 128  }
   0xc   :  { %278 = vsyncadd [#allocation6], 4294967168  ;;  %v40_v0 = vld [vmem:[#allocation5] sm:$0xff]  ;;  %vm42_vm0 = vcmask 261120   ;;  %v39_v1 = vld [vmem:[%s366_s0] sm:$0xff]  ;;  %v280_v6 = vmov 0.0   ;;  %v151_v27 = vlaneseq }
   0xd   :  { %v56_v2 = vmul.f32 %v40_v0, %v40_v0  ;;  %v41_v3 = vmul.f32 %v39_v1, %v39_v1  ;;  %232 = vmatprep.subr.mxu0 %v280_v6  ;;  %vm281_vm1 = vmmov 0   ;;  %v161_v7 = vld [vmem:[%s368_s2] sm:$0xff]  ;;  %v282_v8 = vmov 0  }
   0xe   :  { %234 = vmatprep.mubr.msk.f32.mxu0 %vm281_vm1, %v280_v6  ;;  %241 = vset.pattern.permute.xlu1 %v282_v8  ;;  %v152_v28 = vshrl.u32 %v151_v27, 7  ;;  %v157_v29 = vand.u32 127, %v151_v27  ;;  %v227_v30 = vld [vmem:[%s369_s3] ss:$0 sm:$0xff]  ;;  %vm177_vm9 = vcmask 64512   ;;  %vm35_vm10 = vcmask 7168  }
   0xf   :  { %v57_v4 = vsel %vm42_vm0, %v56_v2, 0.0  ;;  %v43_v5 = vsel %vm42_vm0, %v41_v3, 0.0  ;;  %242 = vset.pattern.permute.xlu0 %v282_v8  ;;  %164 = vperm.xlu1 %241, %v161_v7   ;;  %38 = vst.msk [vmem:[#allocation4] sm:$0xff] %vm35_vm10, %v280_v6  ;;  %36 = vst.msk [vmem:[#allocation2] sm:$0xff] %vm35_vm10, %v280_v6 }
  0x10   :  { %58 = vadd.xlane.f32.xlu0 %v57_v4  ;;  %vm160_vm6 = vcmp.ne.s32.totalorder %v152_v28, %v157_v29  ;;  %37 = vst.msk [vmem:[#allocation3] sm:$0xff] %vm35_vm10, %v280_v6 }
  0x14   :  { %44 = vadd.xlane.f32.xlu0 %v43_v5 }
  0x16   :  { %v190_v42 = vld [vmem:[#allocation4] sm:$0xff]  ;;  %v176_v53 = vld [vmem:[#allocation2] sm:$0xff] }
  0x17   :  { %v184_v50 = vld [vmem:[#allocation3] sm:$0xff] }
  0x8a   :  { %v165_v31 = vpop.permute.xlu1 %164 }
  0x8b   :  { %vm170_vm7 = vcmp.eq.s32.totalorder %v165_v31, %v227_v30 }
  0x8c   :  { %vm332_vm8 = vmand %vm170_vm7, %vm160_vm6 }
  0x8d   :  { %v228_v33 = vsel %vm332_vm8, 1.0, %v280_v6 }
  0x8e   :  { %v191_v34 = vsel %vm177_vm9, %v228_v33, 0.0 }
  0x8f   :  { %192 = vadd.xlane.f32.xlu0 %v191_v34 }
  0x99   :  { %v59_v9 = vpop.xlane.xlu0 %58 }
  0x9a   :  { %243 = vrsqrt.f32 %v59_v9  ;;  %vm62_vm2 = vcmp.eq.f32.partialorder %v59_v9, inf  ;;  %v65_v13 = vand.u32 2147483648, %v59_v9  ;;  %vm64_vm3 = vcmp.eq.f32.partialorder %v59_v9, 0.0 }
  0x9d   :  { %v45_v10 = vpop.xlane.xlu0 %44 }
  0x9e   :  { %245 = vrsqrt.f32 %v45_v10  ;;  %vm48_vm4 = vcmp.eq.f32.partialorder %v45_v10, inf  ;;  %v51_v19 = vand.u32 2147483648, %v45_v10  ;;  %vm50_vm5 = vcmp.eq.f32.partialorder %v45_v10, 0.0 }
  0xa7   :  { %v244_v11 = vpop.eup %243 }
  0xa8   :  { %v61_v12 = vmul.f32 %v244_v11, %v59_v9 }
  0xaa   :  { %v63_v14 = vsel %vm62_vm2, %v59_v9, %v61_v12 }
  0xab   :  { %v246_v15 = vpop.eup %245  ;;  %v66_v16 = vsel %vm64_vm3, %v65_v13, %v63_v14 }
  0xac   :  { %v67_v17 = vmax.f32 %v66_v16, 1e-12  ;;  %v47_v18 = vmul.f32 %v246_v15, %v45_v10 }
  0xae   :  { %247 = vrcp.f32 %v67_v17  ;;  %v49_v20 = vsel %vm48_vm4, %v45_v10, %v47_v18 }
  0xaf   :  { %v52_v21 = vsel %vm50_vm5, %v51_v19, %v49_v20 }
  0xb0   :  { %v53_v22 = vmax.f32 %v52_v21, 1e-12 }
  0xb2   :  { %249 = vrcp.f32 %v53_v22 }
  0xbb   :  { %v248_v23 = vpop.eup %247 }
  0xbc   :  { %v69_v24 = vmul.f32 %v248_v23, %v40_v0 }
  0xbe   :  { %233 = vmatpush3.xpose.msk.msra.mxu0 %vm42_vm0, %v69_v24 }
  0xbf   :  { %v250_v25 = vpop.eup %249 }
  0xc0   :  { %v55_v26 = vmul.f32 %v250_v25, %v39_v1 }
  0xc2   :  { %235 = vmatmul.mubr.msk.f32.vlgmr.msra.gmra.mxu0 %vm42_vm0, %v55_v26 }
 0x118   :  { %v193_v43 = vpop.xlane.xlu0 %192 }
 0x119   :  { %v194_v44 = vadd.f32 %v193_v43, %v190_v42 }
 0x11b   :  { %195 = vst.msk [vmem:[#allocation4] sm:$0xff] %vm35_vm10, %v194_v44 }
 0x122   :  { %v199_v48 = vld [vmem:[#allocation4] sm:$0xff] }
 0x123   :  { %vm200_vm11 = vcmp.gt.f32.partialorder %v199_v48, 0.0 }
 0x124   :  { %v229_v49 = vsel %vm200_vm11, 1.0, %v280_v6  ;;  %v207_v57 = vsel %vm200_vm11, %v199_v48, 1.0 }
 0x125   :  { %214 = vst.msk [vmem:[%s371_s5] sm:$0xff] %vm35_vm10, %v229_v49 }
 0x182   :  { %v142_v35 = vpop.f32.mrf.mxu0 }
 0x183   :  { %v146_v36 = vmul.f32 2.0, %v142_v35 }
 0x184   :  { %v236_v37 = vpop.f32.mrf.mxu0 }
 0x185   :  { %v226_v38 = vadd.f32 -2.0, %v146_v36 }
 0x187   :  { %v148_v39 = vmul.f32 1.442695, %v226_v38  ;;  %v175_v40 = vsel %vm332_vm8, %v226_v38, 0.0 }
 0x188   :  { %v185_v41 = vsel %vm177_vm9, %v175_v40, 0.0 }
 0x189   :  { %251 = vpow2.f32 %v148_v39  ;;  %186 = vadd.xlane.f32.xlu0 %v185_v41 }
 0x196   :  { %v252_v45 = vpop.eup %251 }
 0x197   :  { %v174_v46 = vsel %vm160_vm6, %v252_v45, 0.0 }
 0x198   :  { %v178_v47 = vsel %vm177_vm9, %v174_v46, 0.0 }
 0x199   :  { %179 = vadd.xlane.f32.xlu1 %v178_v47 }
 0x212   :  { %v187_v51 = vpop.xlane.xlu0 %186 }
 0x213   :  { %v188_v52 = vadd.f32 %v187_v51, %v184_v50 }
 0x215   :  { %189 = vst.msk [vmem:[#allocation3] sm:$0xff] %vm35_vm10, %v188_v52 }
 0x21c   :  { %v201_v62 = vld [vmem:[#allocation3] sm:$0xff] }
 0x222   :  { %v180_v54 = vpop.xlane.xlu1 %179 }
 0x223   :  { %v181_v55 = vadd.f32 %v180_v54, %v176_v53 }
 0x225   :  { %183 = vst.msk [vmem:[#allocation2] sm:$0xff] %vm35_vm10, %v181_v55 }
 0x22c   :  { %v202_v56 = vld [vmem:[#allocation2] sm:$0xff] }
 0x22d   :  { %253 = vlog2.f32 %v202_v56 }
 0x22e   :  { %255 = vrcp.f32 %v207_v57 }
 0x23a   :  { %v254_v58 = vpop.eup %253 }
 0x23b   :  { %v204_v59 = vmul.f32 0.6931472, %v254_v58  ;;  %v256_v61 = vpop.eup %255 }
 0x23d   :  { %v205_v60 = vmul.f32 %v204_v59, %v199_v48 }
 0x23f   :  { %v206_v63 = vsub.f32 %v201_v62, %v205_v60 }
 0x241   :  { %v209_v0 = vmul.f32 %v256_v61, %v206_v63 }
 0x243   :  { %v210_v1 = vsel %vm200_vm11, %v209_v0, 0.0 }
 0x244   :  { %211 = vst.msk [vmem:[%s370_s4] sm:$0xff] %vm35_vm10, %v210_v1 }
 0x245   :  { %223 = vsyncpa [#allocation6], 1 }

</bundles_post_ra>
